<compile_context>
chip_gen: v5e
topology: v5e:2x2
jax: 0.10.0
libtpu: 0.0.40
codegen_flags: <defaults>
</compile_context>

<pallas_src>
import functools

import jax
import jax.numpy as jnp
from jax.experimental import pallas as pl
from jax.experimental.pallas import tpu as pltpu


def _round_up(x, m):
    return ((x + m - 1) // m) * m


# ----------------------------------------------------------------------------
# Pallas kernel: one grid step = Bt folded batch elements (flattened to
# (Bt*Lp, H)) through one encoder layer + masked mean pooling.
# ----------------------------------------------------------------------------
def trigger_model_kernel(Bt, Lp, x_ref, kcode_ref, qcode_ref, pool_ref,
                         wqkv_ref, wo_ref, w1_ref, w2_ref, ln_ref, out_ref):
    HP = wo_ref.shape[0]                     # lane-aligned Q/K/V section width
    x = x_ref[...]                           # (Bt*Lp, H) bf16

    # ---- fused, lane-aligned QKV projection: one (BtL,H)x(H,3*HP) matmul ----
    # (softmax 1/sqrt(H) scale is already folded into the Q columns)
    qkv = jnp.dot(x, wqkv_ref[...], preferred_element_type=jnp.float32)
    qkv = qkv.astype(jnp.bfloat16)
    q = qkv[:, :HP]                          # slices land on 128-lane tiles
    k = qkv[:, HP:2 * HP]
    v = qkv[:, 2 * HP:]

    # ---- single-head self-attention over the folded batch ----
    # contraction expressed directly: no k.T materialization (no XLU pass)
    scores = jax.lax.dot_general(
        q, k, dimension_numbers=(((1,), (1,)), ((), ())),
        preferred_element_type=jnp.float32)                  # (BtL, BtL) f32

    # block-diagonal + key-validity mask from precomputed element codes:
    # key code == -1 for masked / pad keys, element id (0..Bt-1) otherwise.
    kcode = kcode_ref[0].astype(jnp.float32)                 # (1, BtL)
    qcode = qcode_ref[0].astype(jnp.float32)                 # (BtL, 1)
    valid = kcode == qcode                                   # (BtL, BtL)
    scores = jnp.where(valid, scores, -1e9)

    # softmax in f32; EUP approximate reciprocal only for the denominator
    scores = scores - jnp.max(scores, axis=-1, keepdims=True)
    p = jnp.exp(scores)
    p = p * pl.reciprocal(jnp.sum(p, axis=-1, keepdims=True), approx=True)

    attn = jnp.dot(p.astype(jnp.bfloat16), v, preferred_element_type=jnp.float32)
    attn = jnp.dot(attn.astype(jnp.bfloat16), wo_ref[...],
                   preferred_element_type=jnp.float32)       # (BtL, H) f32

    g1 = ln_ref[0:1, :]
    b1 = ln_ref[1:2, :]
    g2 = ln_ref[2:3, :]
    b2 = ln_ref[3:4, :]

    # ---- residual + layernorm 1 (single-pass variance) ----
    h = x.astype(jnp.float32) + attn
    mu = jnp.mean(h, axis=-1, keepdims=True)
    var = jnp.mean(h * h, axis=-1, keepdims=True) - mu * mu
    hn = (h - mu) * jax.lax.rsqrt(var + 1e-5) * g1 + b1

    # ---- MLP (bf16 operands, f32 accumulate) ----
    m = jnp.dot(hn.astype(jnp.bfloat16), w1_ref[...],
                preferred_element_type=jnp.float32)
    m = jax.nn.gelu(m, approximate=True)
    m = jnp.dot(m.astype(jnp.bfloat16), w2_ref[...],
                preferred_element_type=jnp.float32)

    # ---- residual + layernorm 2 -> hidden_states[-1] ----
    h2 = hn + m
    mu2 = jnp.mean(h2, axis=-1, keepdims=True)
    var2 = jnp.mean(h2 * h2, axis=-1, keepdims=True) - mu2 * mu2
    last = (h2 - mu2) * jax.lax.rsqrt(var2 + 1e-5) * g2 + b2  # (BtL, H) f32

    # ---- masked mean pooling over original (non-trigger) tokens ----
    # TODO(synk): the PyTorch source expands attention_mask (B,S,1) to
    # last_layer.size() = (B,S+T,H), a latent shape bug; the intended
    # semantics (pool only over data tokens) is implemented here.
    pool = pool_ref[0].astype(jnp.float32)                    # (BtL, 1)
    masked = last * pool                                      # VPU multiply
    sums, dens = [], []
    for b in range(Bt):                                       # static unroll
        lo = b * Lp                                           # sublane-aligned slice
        sums.append(jnp.sum(masked[lo:lo + Lp, :], axis=0, keepdims=True))
        dens.append(jnp.sum(pool[lo:lo + Lp, :], axis=0, keepdims=True))
    sum_emb = jnp.concatenate(sums, axis=0)                   # (Bt, H)
    den = jnp.maximum(jnp.concatenate(dens, axis=0), 1e-9)    # (Bt, 1)
    # exact division for the output normalization (accuracy of pooled emb)
    out_ref[0] = sum_emb / den


# ----------------------------------------------------------------------------
# Wrapper: embedding lookup, trigger concat, padding, compact mask codes
# (glue in JAX), then one pallas_call (parallel grid over folded batch).
# ----------------------------------------------------------------------------
def _pick_batch_tile(B, requested):
    bt = max(1, min(requested, B))
    while B % bt:
        bt -= 1
    if B // bt < 2:          # keep >=2 grid steps when possible (v7x has 2 TCs)
        for cand in range(bt, 0, -1):
            if B % cand == 0 and B // cand >= 2:
                return cand
    return bt


def trigger_tuned_forward(packed, input_ids, attention_mask, *, batch_tile=2):
    emb_table = packed['embed']             # (V, H) f32
    trigger_emb = packed['trigger_emb']     # (1, T, H) f32
    B, S = input_ids.shape
    T = trigger_emb.shape[1]
    H = emb_table.shape[1]
    F = packed['w1'].shape[1]
    HP = packed['wo'].shape[0]              # padded Q/K/V section width

    L = S + T
    Lp = _round_up(L, 16)                   # sublane-aligned per-element length
    pad = Lp - L
    Bt = _pick_batch_tile(B, batch_tile)
    G = B // Bt
    BtL = Bt * Lp

    # base_model.get_input_embeddings()(input_ids); trigger repeat + concat
    data_embeds = jnp.take(emb_table, input_ids, axis=0)              # (B, S, H)
    trig = jnp.broadcast_to(trigger_emb, (B, T, H))
    full = jnp.concatenate([data_embeds, trig], axis=1)               # (B, L, H)
    if pad:
        full = jnp.concatenate(
            [full, jnp.zeros((B, pad, H), full.dtype)], axis=1)       # (B, Lp, H)
    x_flat = full.astype(jnp.bfloat16).reshape(B * Lp, H)             # halve HBM traffic

    # compact per-token element codes (bf16): key code = -1 when the token may
    # not be attended to, otherwise the element's local id; the -1e9 bias is
    # realized in-kernel as a single select.
    am = attention_mask.astype(jnp.float32)
    key_mask = jnp.concatenate(
        [am, jnp.ones((B, T), jnp.float32), jnp.zeros((B, pad), jnp.float32)], axis=1)
    pool_mask = jnp.concatenate(
        [am, jnp.zeros((B, T + pad), jnp.float32)], axis=1)           # (B, Lp)
    local_id = (jnp.arange(B) % Bt).astype(jnp.float32)
    qcode = jnp.broadcast_to(local_id[:, None], (B, Lp))
    kcode = jnp.where(key_mask > 0.5, qcode, -1.0)

    key_code_row = kcode.reshape(G, 1, BtL).astype(jnp.bfloat16)
    q_code_col = qcode.reshape(G, BtL, 1).astype(jnp.bfloat16)
    pool_col = pool_mask.reshape(G, BtL, 1).astype(jnp.bfloat16)

    # explicit VMEM budget (review): generous for double-buffered blocks +
    # intermediates, clamped to fit v7x's 64 MiB physical VMEM.
    block_bytes = (BtL * H * 2 + 3 * BtL * 2 +
                   H * 3 * HP * 2 + HP * H * 2 + H * F * 2 + F * H * 2 +
                   4 * H * 4 + Bt * H * 4)
    vmem_limit = int(min(max(6 * block_bytes, 16 << 20), 48 << 20))

    kernel = functools.partial(trigger_model_kernel, Bt, Lp)

    out = pl.pallas_call(
        kernel,
        out_shape=jax.ShapeDtypeStruct((G, Bt, H), jnp.float32),
        grid=(G,),
        in_specs=[
            pl.BlockSpec((BtL, H), lambda i: (i, 0)),          # folded embeds
            pl.BlockSpec((1, 1, BtL), lambda i: (i, 0, 0)),    # key element codes (row)
            pl.BlockSpec((1, BtL, 1), lambda i: (i, 0, 0)),    # query element codes (col)
            pl.BlockSpec((1, BtL, 1), lambda i: (i, 0, 0)),    # pooling mask (col)
            # Weights: constant index_map -> DMA'd once, resident across grid.
            # TODO(synk): at realistic H, single-buffer these (pl.Buffered(1)) or
            # add an F-reduction grid axis / fp8 weights to fit v7x's 64 MiB VMEM.
            pl.BlockSpec((H, 3 * HP), lambda i: (0, 0)),       # fused wqkv (Q pre-scaled)
            pl.BlockSpec((HP, H), lambda i: (0, 0)),           # wo (zero-padded rows)
            pl.BlockSpec((H, F), lambda i: (0, 0)),            # w1
            pl.BlockSpec((F, H), lambda i: (0, 0)),            # w2
            pl.BlockSpec((4, H), lambda i: (0, 0)),            # packed LN params
        ],
        out_specs=pl.BlockSpec((1, Bt, H), lambda i: (i, 0, 0)),
        compiler_params=pltpu.CompilerParams(
            dimension_semantics=("parallel",),                 # megacore on v7x
            vmem_limit_bytes=vmem_limit),
    )(x_flat, key_code_row, q_code_col, pool_col,
      packed['wqkv'], packed['wo'], packed['w1'], packed['w2'], packed['ln'])
    return out.reshape(B, H)


def init_params(key, vocab, hidden, mlp_hidden, trigger_length):
    ks = jax.random.split(key, 10)
    s = 0.02
    return {
        'embed':       jax.random.normal(ks[0], (vocab, hidden), jnp.float32) * s,
        'trigger_emb': jax.random.normal(ks[1], (1, trigger_length, hidden), jnp.float32),
        'wq': jax.random.normal(ks[2], (hidden, hidden), jnp.float32) * s,
        'wk': jax.random.normal(ks[3], (hidden, hidden), jnp.float32) * s,
        'wv': jax.random.normal(ks[4], (hidden, hidden), jnp.float32) * s,
        'wo': jax.random.normal(ks[5], (hidden, hidden), jnp.float32) * s,
        'w1': jax.random.normal(ks[6], (hidden, mlp_hidden), jnp.float32) * s,
        'w2': jax.random.normal(ks[7], (mlp_hidden, hidden), jnp.float32) * s,
        'ln1_g': jnp.ones((hidden,), jnp.float32),
        'ln1_b': jnp.zeros((hidden,), jnp.float32),
        'ln2_g': jnp.ones((hidden,), jnp.float32),
        'ln2_b': jnp.zeros((hidden,), jnp.float32),
        # register_buffer('e_star', ...): kept for parity, unused in forward.
        'e_star': jax.random.normal(ks[8], (hidden,), jnp.float32),
    }


def pack_params(params):
    """One-time packing: fuse+pad QKV (lane-aligned sections, Q pre-scaled by
    1/sqrt(H)), pad wo rows, cast matmul weights to bf16, pack LN params."""
    H = params['wq'].shape[0]
    HP = _round_up(H, 128)
    scale = H ** -0.5
    wqkv = jnp.zeros((H, 3 * HP), jnp.float32)
    wqkv = wqkv.at[:, 0:H].set(params['wq'] * scale)
    wqkv = wqkv.at[:, HP:HP + H].set(params['wk'])
    wqkv = wqkv.at[:, 2 * HP:2 * HP + H].set(params['wv'])
    wo = jnp.zeros((HP, H), jnp.float32).at[0:H, :].set(params['wo'])
    ln = jnp.stack([params['ln1_g'], params['ln1_b'],
                    params['ln2_g'], params['ln2_b']], axis=0)
    return {
        'embed': params['embed'],
        'trigger_emb': params['trigger_emb'],
        'wqkv': wqkv.astype(jnp.bfloat16),
        'wo': wo.astype(jnp.bfloat16),
        'w1': params['w1'].astype(jnp.bfloat16),
        'w2': params['w2'].astype(jnp.bfloat16),
        'ln': ln.astype(jnp.float32),
    }


def reference_forward(params, input_ids, attention_mask):
    """Pure-JAX f32 reference of the same synthetic encoder (exact softmax)."""
    emb_table = params['embed']
    trig = params['trigger_emb']
    B, S = input_ids.shape
    T = trig.shape[1]
    H = emb_table.shape[1]
    x = jnp.take(emb_table, input_ids, axis=0)
    x = jnp.concatenate([x, jnp.broadcast_to(trig, (B, T, H))], axis=1)
    am = attention_mask.astype(jnp.float32)
    full_mask = jnp.concatenate([am, jnp.ones((B, T), jnp.float32)], axis=1)
    bias = (1.0 - full_mask)[:, None, :] * -1e9

    q = x @ params['wq']
    k = x @ params['wk']
    v = x @ params['wv']
    s = jnp.einsum('bqh,bkh->bqk', q, k) * (H ** -0.5) + bias
    p = jax.nn.softmax(s, axis=-1)
    a = jnp.einsum('bqk,bkh->bqh', p, v) @ params['wo']

    def ln(z, g, b):
        mu = jnp.mean(z, axis=-1, keepdims=True)
        var = jnp.mean((z - mu) ** 2, axis=-1, keepdims=True)
        return (z - mu) * jax.lax.rsqrt(var + 1e-5) * g + b

    hn = ln(x + a, params['ln1_g'], params['ln1_b'])
    m = jax.nn.gelu(hn @ params['w1'], approximate=True) @ params['w2']
    last = ln(hn + m, params['ln2_g'], params['ln2_b'])

    pool = jnp.concatenate([am, jnp.zeros((B, T), jnp.float32)], axis=1)[:, :, None]
    sum_emb = jnp.sum(last * pool, axis=1)
    den = jnp.maximum(jnp.sum(pool, axis=1), 1e-9)
    return sum_emb / den


if __name__ == "__main__":
    B, S, T, H, V, F = 4, 8, 4, 32, 64, 64

    key = jax.random.PRNGKey(0)
    pkey, ikey = jax.random.split(key)
    params = init_params(pkey, vocab=V, hidden=H, mlp_hidden=F, trigger_length=T)
    packed = pack_params(params)

    input_ids = jax.random.randint(ikey, (B, S), 0, V, dtype=jnp.int32)
    attention_mask = jnp.array(
        [[1] * S,
         [1] * (S - 2) + [0, 0],
         [1] * (S - 3) + [0, 0, 0],
         [1] * S], dtype=jnp.int32)

    out = trigger_tuned_forward(packed, input_ids, attention_mask, batch_tile=2)
    out = jax.block_until_ready(out)

    assert out.shape == (B, H) and out.dtype == jnp.float32
    assert bool(jnp.all(jnp.isfinite(out)))

    # loose-tolerance parity vs. f32 reference (kernel uses bf16 matmul operands
    # and an approximate-reciprocal softmax denominator)
    ref = reference_forward(params, input_ids, attention_mask)
    max_err = float(jnp.max(jnp.abs(out - ref)))
    assert max_err < 0.1, f"max abs error vs reference = {max_err}"

    print("KERNEL_OK")
</pallas_src>

<mosaic_0001>
module attributes {stable_mosaic.version = 11 : i64} {
  func.func @trigger_model_kernel(%arg0: i32, %arg1: memref<32x32xbf16, #tpu.memory_space<vmem>>, %arg2: memref<1x1x32xbf16, #tpu.memory_space<vmem>>, %arg3: memref<1x32x1xbf16, #tpu.memory_space<vmem>>, %arg4: memref<1x32x1xbf16, #tpu.memory_space<vmem>>, %arg5: memref<32x384xbf16, #tpu.memory_space<vmem>>, %arg6: memref<128x32xbf16, #tpu.memory_space<vmem>>, %arg7: memref<32x64xbf16, #tpu.memory_space<vmem>>, %arg8: memref<64x32xbf16, #tpu.memory_space<vmem>>, %arg9: memref<4x32xf32, #tpu.memory_space<vmem>>, %arg10: memref<1x2x32xf32, #tpu.memory_space<vmem>>) attributes {dimension_semantics = [#tpu.dimension_semantics<parallel>], iteration_bounds = array<i64: 2>, scalar_prefetch = 0 : i64, scratch_operands = 0 : i64, tpu.core_type = #tpu.core_type<tc>, window_params = [{transform_indices = @transform_0, window_bounds = array<i64: 32, 32>}, {transform_indices = @transform_1, window_bounds = array<i64: 1, 1, 32>}, {transform_indices = @transform_2, window_bounds = array<i64: 1, 32, 1>}, {transform_indices = @transform_3, window_bounds = array<i64: 1, 32, 1>}, {pipeline_mode = #tpu.pipeline_mode<synchronous>, transform_indices = @transform_4, window_bounds = array<i64: 32, 384>}, {pipeline_mode = #tpu.pipeline_mode<synchronous>, transform_indices = @transform_5, window_bounds = array<i64: 128, 32>}, {pipeline_mode = #tpu.pipeline_mode<synchronous>, transform_indices = @transform_6, window_bounds = array<i64: 32, 64>}, {pipeline_mode = #tpu.pipeline_mode<synchronous>, transform_indices = @transform_7, window_bounds = array<i64: 64, 32>}, {pipeline_mode = #tpu.pipeline_mode<synchronous>, transform_indices = @transform_8, window_bounds = array<i64: 4, 32>}, {transform_indices = @transform_9, window_bounds = array<i64: 1, 2, 32>}]} {
    %c0 = arith.constant 0 : index
    %c0_0 = arith.constant 0 : index
    %0 = vector.load %arg1[%c0, %c0_0] : memref<32x32xbf16, #tpu.memory_space<vmem>>, vector<32x32xbf16>
    %c0_1 = arith.constant 0 : index
    %c0_2 = arith.constant 0 : index
    %1 = vector.load %arg5[%c0_1, %c0_2] : memref<32x384xbf16, #tpu.memory_space<vmem>>, vector<32x384xbf16>
    %cst = arith.constant dense<0.000000e+00> : vector<32x384xf32>
    %2 = tpu.matmul %0, %1, %cst {dimension_numbers = #tpu.dot_dimension_numbers<[1], [0], [0], [1], [0, 0, 1, 1], [], []>} : vector<32x32xbf16>, vector<32x384xbf16>, vector<32x384xf32> -> vector<32x384xf32>
    %3 = arith.truncf %2 : vector<32x384xf32> to vector<32x384xbf16>
    %4 = vector.extract_strided_slice %3 {offsets = [0, 0], sizes = [32, 128], strides = [1, 1]} : vector<32x384xbf16> to vector<32x128xbf16>
    %5 = vector.extract_strided_slice %3 {offsets = [0, 128], sizes = [32, 128], strides = [1, 1]} : vector<32x384xbf16> to vector<32x128xbf16>
    %6 = vector.extract_strided_slice %3 {offsets = [0, 256], sizes = [32, 128], strides = [1, 1]} : vector<32x384xbf16> to vector<32x128xbf16>
    %cst_3 = arith.constant dense<0.000000e+00> : vector<32x32xf32>
    %7 = tpu.matmul %4, %5, %cst_3 {dimension_numbers = #tpu.dot_dimension_numbers<[1], [1], [0], [0], [0, 0, 1, 0], [], []>} : vector<32x128xbf16>, vector<32x128xbf16>, vector<32x32xf32> -> vector<32x32xf32>
    %c0_4 = arith.constant 0 : index
    %c0_5 = arith.constant 0 : index
    %c0_6 = arith.constant 0 : index
    %8 = vector.load %arg2[%c0_4, %c0_5, %c0_6] : memref<1x1x32xbf16, #tpu.memory_space<vmem>>, vector<1x1x32xbf16>
    %9 = vector.shape_cast %8 : vector<1x1x32xbf16> to vector<1x32xbf16>
    %10 = arith.extf %9 : vector<1x32xbf16> to vector<1x32xf32>
    %c0_7 = arith.constant 0 : index
    %c0_8 = arith.constant 0 : index
    %c0_9 = arith.constant 0 : index
    %11 = vector.load %arg3[%c0_7, %c0_8, %c0_9] : memref<1x32x1xbf16, #tpu.memory_space<vmem>>, vector<1x32x1xbf16>
    %12 = vector.shape_cast %11 : vector<1x32x1xbf16> to vector<32x1xbf16>
    %13 = arith.extf %12 : vector<32x1xbf16> to vector<32x1xf32>
    %14 = vector.broadcast %10 : vector<1x32xf32> to vector<32x32xf32>
    %15 = vector.broadcast %13 : vector<32x1xf32> to vector<32x32xf32>
    %16 = arith.cmpf oeq, %14, %15 : vector<32x32xf32>
    %cst_10 = arith.constant -1.000000e+09 : f32
    %17 = vector.broadcast %cst_10 : f32 to vector<32x32xf32>
    %18 = arith.select %16, %7, %17 : vector<32x32xi1>, vector<32x32xf32>
    %cst_11 = arith.constant dense<0xFF800000> : vector<32xf32>
    %19 = vector.multi_reduction <maximumf>, %18, %cst_11 [1] : vector<32x32xf32> to vector<32xf32>
    %20 = vector.shape_cast %19 : vector<32xf32> to vector<32x1xf32>
    %21 = vector.broadcast %20 : vector<32x1xf32> to vector<32x32xf32>
    %22 = arith.subf %18, %21 : vector<32x32xf32>
    %23 = math.exp %22 : vector<32x32xf32>
    %cst_12 = arith.constant dense<0.000000e+00> : vector<32xf32>
    %24 = vector.multi_reduction <add>, %23, %cst_12 [1] : vector<32x32xf32> to vector<32xf32>
    %25 = vector.shape_cast %24 : vector<32xf32> to vector<32x1xf32>
    %26 = tpu.reciprocal %25 {approx = true} : vector<32x1xf32> -> vector<32x1xf32>
    %27 = vector.broadcast %26 : vector<32x1xf32> to vector<32x32xf32>
    %28 = arith.mulf %23, %27 : vector<32x32xf32>
    %29 = arith.truncf %28 : vector<32x32xf32> to vector<32x32xbf16>
    %cst_13 = arith.constant dense<0.000000e+00> : vector<32x128xf32>
    %30 = tpu.matmul %29, %6, %cst_13 {dimension_numbers = #tpu.dot_dimension_numbers<[1], [0], [0], [1], [0, 0, 1, 1], [], []>} : vector<32x32xbf16>, vector<32x128xbf16>, vector<32x128xf32> -> vector<32x128xf32>
    %31 = arith.truncf %30 : vector<32x128xf32> to vector<32x128xbf16>
    %c0_14 = arith.constant 0 : index
    %c0_15 = arith.constant 0 : index
    %32 = vector.load %arg6[%c0_14, %c0_15] : memref<128x32xbf16, #tpu.memory_space<vmem>>, vector<128x32xbf16>
    %cst_16 = arith.constant dense<0.000000e+00> : vector<32x32xf32>
    %33 = tpu.matmul %31, %32, %cst_16 {dimension_numbers = #tpu.dot_dimension_numbers<[1], [0], [0], [1], [0, 0, 1, 1], [], []>} : vector<32x128xbf16>, vector<128x32xbf16>, vector<32x32xf32> -> vector<32x32xf32>
    %c0_17 = arith.constant 0 : index
    %c0_18 = arith.constant 0 : index
    %34 = vector.load %arg9[%c0_17, %c0_18] : memref<4x32xf32, #tpu.memory_space<vmem>>, vector<1x32xf32>
    %c1 = arith.constant 1 : index
    %c0_19 = arith.constant 0 : index
    %35 = vector.load %arg9[%c1, %c0_19] : memref<4x32xf32, #tpu.memory_space<vmem>>, vector<1x32xf32>
    %c2 = arith.constant 2 : index
    %c0_20 = arith.constant 0 : index
    %36 = vector.load %arg9[%c2, %c0_20] : memref<4x32xf32, #tpu.memory_space<vmem>>, vector<1x32xf32>
    %c3 = arith.constant 3 : index
    %c0_21 = arith.constant 0 : index
    %37 = vector.load %arg9[%c3, %c0_21] : memref<4x32xf32, #tpu.memory_space<vmem>>, vector<1x32xf32>
    %38 = arith.extf %0 : vector<32x32xbf16> to vector<32x32xf32>
    %39 = arith.addf %38, %33 : vector<32x32xf32>
    %cst_22 = arith.constant dense<0.000000e+00> : vector<32xf32>
    %40 = vector.multi_reduction <add>, %39, %cst_22 [1] : vector<32x32xf32> to vector<32xf32>
    %41 = vector.shape_cast %40 : vector<32xf32> to vector<32x1xf32>
    %cst_23 = arith.constant 3.200000e+01 : f32
    %42 = vector.broadcast %cst_23 : f32 to vector<32x1xf32>
    %43 = arith.divf %41, %42 : vector<32x1xf32>
    %44 = arith.mulf %39, %39 : vector<32x32xf32>
    %cst_24 = arith.constant dense<0.000000e+00> : vector<32xf32>
    %45 = vector.multi_reduction <add>, %44, %cst_24 [1] : vector<32x32xf32> to vector<32xf32>
    %46 = vector.shape_cast %45 : vector<32xf32> to vector<32x1xf32>
    %cst_25 = arith.constant 3.200000e+01 : f32
    %47 = vector.broadcast %cst_25 : f32 to vector<32x1xf32>
    %48 = arith.divf %46, %47 : vector<32x1xf32>
    %49 = arith.mulf %43, %43 : vector<32x1xf32>
    %50 = arith.subf %48, %49 : vector<32x1xf32>
    %51 = vector.broadcast %43 : vector<32x1xf32> to vector<32x32xf32>
    %52 = arith.subf %39, %51 : vector<32x32xf32>
    %cst_26 = arith.constant 9.99999974E-6 : f32
    %53 = vector.broadcast %cst_26 : f32 to vector<32x1xf32>
    %54 = arith.addf %50, %53 : vector<32x1xf32>
    %55 = math.rsqrt %54 : vector<32x1xf32>
    %56 = vector.broadcast %55 : vector<32x1xf32> to vector<32x32xf32>
    %57 = arith.mulf %52, %56 : vector<32x32xf32>
    %58 = vector.broadcast %34 : vector<1x32xf32> to vector<32x32xf32>
    %59 = arith.mulf %57, %58 : vector<32x32xf32>
    %60 = vector.broadcast %35 : vector<1x32xf32> to vector<32x32xf32>
    %61 = arith.addf %59, %60 : vector<32x32xf32>
    %62 = arith.truncf %61 : vector<32x32xf32> to vector<32x32xbf16>
    %c0_27 = arith.constant 0 : index
    %c0_28 = arith.constant 0 : index
    %63 = vector.load %arg7[%c0_27, %c0_28] : memref<32x64xbf16, #tpu.memory_space<vmem>>, vector<32x64xbf16>
    %cst_29 = arith.constant dense<0.000000e+00> : vector<32x64xf32>
    %64 = tpu.matmul %62, %63, %cst_29 {dimension_numbers = #tpu.dot_dimension_numbers<[1], [0], [0], [1], [0, 0, 1, 1], [], []>} : vector<32x32xbf16>, vector<32x64xbf16>, vector<32x64xf32> -> vector<32x64xf32>
    %65 = arith.mulf %64, %64 : vector<32x64xf32>
    %66 = arith.mulf %64, %65 : vector<32x64xf32>
    %cst_30 = arith.constant 4.471500e-02 : f32
    %67 = vector.broadcast %cst_30 : f32 to vector<32x64xf32>
    %68 = arith.mulf %67, %66 : vector<32x64xf32>
    %69 = arith.addf %64, %68 : vector<32x64xf32>
    %cst_31 = arith.constant 0.797884583 : f32
    %70 = vector.broadcast %cst_31 : f32 to vector<32x64xf32>
    %71 = arith.mulf %70, %69 : vector<32x64xf32>
    %72 = math.tanh %71 : vector<32x64xf32>
    %cst_32 = arith.constant 1.000000e+00 : f32
    %73 = vector.broadcast %cst_32 : f32 to vector<32x64xf32>
    %74 = arith.addf %73, %72 : vector<32x64xf32>
    %cst_33 = arith.constant 5.000000e-01 : f32
    %75 = vector.broadcast %cst_33 : f32 to vector<32x64xf32>
    %76 = arith.mulf %75, %74 : vector<32x64xf32>
    %77 = arith.mulf %64, %76 : vector<32x64xf32>
    %78 = arith.truncf %77 : vector<32x64xf32> to vector<32x64xbf16>
    %c0_34 = arith.constant 0 : index
    %c0_35 = arith.constant 0 : index
    %79 = vector.load %arg8[%c0_34, %c0_35] : memref<64x32xbf16, #tpu.memory_space<vmem>>, vector<64x32xbf16>
    %cst_36 = arith.constant dense<0.000000e+00> : vector<32x32xf32>
    %80 = tpu.matmul %78, %79, %cst_36 {dimension_numbers = #tpu.dot_dimension_numbers<[1], [0], [0], [1], [0, 0, 1, 1], [], []>} : vector<32x64xbf16>, vector<64x32xbf16>, vector<32x32xf32> -> vector<32x32xf32>
    %81 = arith.addf %61, %80 : vector<32x32xf32>
    %cst_37 = arith.constant dense<0.000000e+00> : vector<32xf32>
    %82 = vector.multi_reduction <add>, %81, %cst_37 [1] : vector<32x32xf32> to vector<32xf32>
    %83 = vector.shape_cast %82 : vector<32xf32> to vector<32x1xf32>
    %cst_38 = arith.constant 3.200000e+01 : f32
    %84 = vector.broadcast %cst_38 : f32 to vector<32x1xf32>
    %85 = arith.divf %83, %84 : vector<32x1xf32>
    %86 = arith.mulf %81, %81 : vector<32x32xf32>
    %cst_39 = arith.constant dense<0.000000e+00> : vector<32xf32>
    %87 = vector.multi_reduction <add>, %86, %cst_39 [1] : vector<32x32xf32> to vector<32xf32>
    %88 = vector.shape_cast %87 : vector<32xf32> to vector<32x1xf32>
    %cst_40 = arith.constant 3.200000e+01 : f32
    %89 = vector.broadcast %cst_40 : f32 to vector<32x1xf32>
    %90 = arith.divf %88, %89 : vector<32x1xf32>
    %91 = arith.mulf %85, %85 : vector<32x1xf32>
    %92 = arith.subf %90, %91 : vector<32x1xf32>
    %93 = vector.broadcast %85 : vector<32x1xf32> to vector<32x32xf32>
    %94 = arith.subf %81, %93 : vector<32x32xf32>
    %cst_41 = arith.constant 9.99999974E-6 : f32
    %95 = vector.broadcast %cst_41 : f32 to vector<32x1xf32>
    %96 = arith.addf %92, %95 : vector<32x1xf32>
    %97 = math.rsqrt %96 : vector<32x1xf32>
    %98 = vector.broadcast %97 : vector<32x1xf32> to vector<32x32xf32>
    %99 = arith.mulf %94, %98 : vector<32x32xf32>
    %100 = vector.broadcast %36 : vector<1x32xf32> to vector<32x32xf32>
    %101 = arith.mulf %99, %100 : vector<32x32xf32>
    %102 = vector.broadcast %37 : vector<1x32xf32> to vector<32x32xf32>
    %103 = arith.addf %101, %102 : vector<32x32xf32>
    %c0_42 = arith.constant 0 : index
    %c0_43 = arith.constant 0 : index
    %c0_44 = arith.constant 0 : index
    %104 = vector.load %arg4[%c0_42, %c0_43, %c0_44] : memref<1x32x1xbf16, #tpu.memory_space<vmem>>, vector<1x32x1xbf16>
    %105 = vector.shape_cast %104 : vector<1x32x1xbf16> to vector<32x1xbf16>
    %106 = arith.extf %105 : vector<32x1xbf16> to vector<32x1xf32>
    %107 = vector.broadcast %106 : vector<32x1xf32> to vector<32x32xf32>
    %108 = arith.mulf %103, %107 : vector<32x32xf32>
    %109 = vector.extract_strided_slice %108 {offsets = [0, 0], sizes = [16, 32], strides = [1, 1]} : vector<32x32xf32> to vector<16x32xf32>
    %cst_45 = arith.constant dense<0.000000e+00> : vector<32xf32>
    %110 = vector.multi_reduction <add>, %109, %cst_45 [0] : vector<16x32xf32> to vector<32xf32>
    %111 = vector.shape_cast %110 : vector<32xf32> to vector<1x32xf32>
    %112 = vector.extract_strided_slice %106 {offsets = [0, 0], sizes = [16, 1], strides = [1, 1]} : vector<32x1xf32> to vector<16x1xf32>
    %cst_46 = arith.constant dense<0.000000e+00> : vector<1xf32>
    %113 = vector.multi_reduction <add>, %112, %cst_46 [0] : vector<16x1xf32> to vector<1xf32>
    %114 = vector.shape_cast %113 : vector<1xf32> to vector<1x1xf32>
    %115 = vector.extract_strided_slice %108 {offsets = [16, 0], sizes = [16, 32], strides = [1, 1]} : vector<32x32xf32> to vector<16x32xf32>
    %cst_47 = arith.constant dense<0.000000e+00> : vector<32xf32>
    %116 = vector.multi_reduction <add>, %115, %cst_47 [0] : vector<16x32xf32> to vector<32xf32>
    %117 = vector.shape_cast %116 : vector<32xf32> to vector<1x32xf32>
    %118 = vector.extract_strided_slice %106 {offsets = [16, 0], sizes = [16, 1], strides = [1, 1]} : vector<32x1xf32> to vector<16x1xf32>
    %cst_48 = arith.constant dense<0.000000e+00> : vector<1xf32>
    %119 = vector.multi_reduction <add>, %118, %cst_48 [0] : vector<16x1xf32> to vector<1xf32>
    %120 = vector.shape_cast %119 : vector<1xf32> to vector<1x1xf32>
    %121 = tpu.concatenate %111, %117 in 0 : vector<1x32xf32>, vector<1x32xf32> -> vector<2x32xf32>
    %122 = tpu.concatenate %114, %120 in 0 : vector<1x1xf32>, vector<1x1xf32> -> vector<2x1xf32>
    %cst_49 = arith.constant 9.99999971E-10 : f32
    %123 = vector.broadcast %cst_49 : f32 to vector<2x1xf32>
    %124 = arith.maximumf %122, %123 : vector<2x1xf32>
    %125 = vector.broadcast %124 : vector<2x1xf32> to vector<2x32xf32>
    %126 = arith.divf %121, %125 : vector<2x32xf32>
    %c0_50 = arith.constant 0 : index
    %c0_51 = arith.constant 0 : index
    %c0_52 = arith.constant 0 : index
    %127 = vector.load %arg10[%c0_50, %c0_51, %c0_52] : memref<1x2x32xf32, #tpu.memory_space<vmem>>, vector<1x2x32xf32>
    %128 = vector.shape_cast %127 : vector<1x2x32xf32> to vector<2x32xf32>
    %129 = vector.shape_cast %126 : vector<2x32xf32> to vector<1x2x32xf32>
    tpu.vector_store %arg10[%c0_50, %c0_51, %c0_52], %129 {strides = array<i32>} : memref<1x2x32xf32, #tpu.memory_space<vmem>>, vector<1x2x32xf32>,
    return
  }
  func.func @transform_0(%arg0: i32) -> (i32, i32) {
    %c0_i32 = arith.constant 0 : i32
    %c0_i32_0 = arith.constant 0 : i32
    return %arg0, %c0_i32 : i32, i32
  }
  func.func @transform_1(%arg0: i32) -> (i32, i32, i32) {
    %c0_i32 = arith.constant 0 : i32
    %c0_i32_0 = arith.constant 0 : i32
    %c0_i32_1 = arith.constant 0 : i32
    return %arg0, %c0_i32, %c0_i32_0 : i32, i32, i32
  }
  func.func @transform_2(%arg0: i32) -> (i32, i32, i32) {
    %c0_i32 = arith.constant 0 : i32
    %c0_i32_0 = arith.constant 0 : i32
    %c0_i32_1 = arith.constant 0 : i32
    return %arg0, %c0_i32, %c0_i32_0 : i32, i32, i32
  }
  func.func @transform_3(%arg0: i32) -> (i32, i32, i32) {
    %c0_i32 = arith.constant 0 : i32
    %c0_i32_0 = arith.constant 0 : i32
    %c0_i32_1 = arith.constant 0 : i32
    return %arg0, %c0_i32, %c0_i32_0 : i32, i32, i32
  }
  func.func @transform_4(%arg0: i32) -> (i32, i32) {
    %c0_i32 = arith.constant 0 : i32
    %c0_i32_0 = arith.constant 0 : i32
    %c0_i32_1 = arith.constant 0 : i32
    return %c0_i32, %c0_i32_0 : i32, i32
  }
  func.func @transform_5(%arg0: i32) -> (i32, i32) {
    %c0_i32 = arith.constant 0 : i32
    %c0_i32_0 = arith.constant 0 : i32
    %c0_i32_1 = arith.constant 0 : i32
    return %c0_i32, %c0_i32_0 : i32, i32
  }
  func.func @transform_6(%arg0: i32) -> (i32, i32) {
    %c0_i32 = arith.constant 0 : i32
    %c0_i32_0 = arith.constant 0 : i32
    %c0_i32_1 = arith.constant 0 : i32
    return %c0_i32, %c0_i32_0 : i32, i32
  }
  func.func @transform_7(%arg0: i32) -> (i32, i32) {
    %c0_i32 = arith.constant 0 : i32
    %c0_i32_0 = arith.constant 0 : i32
    %c0_i32_1 = arith.constant 0 : i32
    return %c0_i32, %c0_i32_0 : i32, i32
  }
  func.func @transform_8(%arg0: i32) -> (i32, i32) {
    %c0_i32 = arith.constant 0 : i32
    %c0_i32_0 = arith.constant 0 : i32
    %c0_i32_1 = arith.constant 0 : i32
    return %c0_i32, %c0_i32_0 : i32, i32
  }
  func.func @transform_9(%arg0: i32) -> (i32, i32, i32) {
    %c0_i32 = arith.constant 0 : i32
    %c0_i32_0 = arith.constant 0 : i32
    %c0_i32_1 = arith.constant 0 : i32
    return %arg0, %c0_i32, %c0_i32_0 : i32, i32, i32
  }
}

</mosaic_0001>

<bundles_post_ra>
// kernel: tpu_custom_call.1
= control target key start
LH: loop header
LB: loop body
LE: loop exit
PB: predicated region body
PF: predicated region fallthrough
CT: control target
= control target key end

     0   :  { %14 = vsyncpa [#allocation3], 0  ;;  %s2067_s0 = inlined_call_operand.vmem [shape: bf16[64,32], index: 0, kind: input, shape index: {}]   ;;  %s2068_s1 = inlined_call_operand.vmem [shape: bf16[2,1,32], index: 1, kind: input, shape index: {}]   ;;  %s2069_s2 = inlined_call_operand.vmem [shape: bf16[2,32,1], index: 2, kind: input, shape index: {}]   ;;  %s2070_s3 = inlined_call_operand.vmem [shape: bf16[2,32,1], index: 3, kind: input, shape index: {}]   ;;  %s2071_s4 = inlined_call_operand.vmem [shape: bf16[32,384], index: 4, kind: input, shape index: {}]   ;;  %s2072_s5 = inlined_call_operand.vmem [shape: bf16[128,32], index: 5, kind: input, shape index: {}]   ;;  %s2073_s6 = inlined_call_operand.vmem [shape: bf16[32,64], index: 6, kind: input, shape index: {}]   ;;  %s2074_s7 = inlined_call_operand.vmem [shape: bf16[64,32], index: 7, kind: input, shape index: {}]   ;;  %s2075_s8 = inlined_call_operand.vmem [shape: f32[4,32], index: 8, kind: input, shape index: {}]   ;;  %s2076_s9 = inlined_call_operand.hbm [shape: f32[2,2,32], index: 9, kind: output, shape index: {}]  }
   0x1   :  { %16 = vsyncpa [#allocation3 + $0x1], 0  ;;  %s1722_s30 = smov 0   ;;  %s1724_s10 = smov 0  }
   0x2   :  { %s1726_s11 = smov 0   ;;  %s1728_s12 = smov 0  }
   0x3 LB: > { %s1743_s13 = sadd.s32 4294967295, %s1668_s12   ;;  %s1337_s14 = sadd.s32 4294967294, %s1668_s12   ;;  %s1668_s12 = sphi %s1728_s12, %s2082_s12   ;;  %s1664_s11 = sphi %s1726_s11, %s2081_s11   ;;  %s1660_s10 = sphi %s1724_s10, %s2080_s10   ;;  %s1656_s30 = sphi %s1722_s30, %s2079_s30  }
   0x4   : > { %s1747_s15 = sadd.s32 1, %s1668_s12   ;;  %s238_s16 = sadd.s32 1, %s1664_s11 }
   0x5   : > { %s235_s17 = ssub.s32 %s1668_s12, %s1747_s15  ;;  %p248_p0 = scmp.ne.s32.totalorder %s1664_s11, %s1660_s10 }
   0x6   : > { %p236_p1 = scmp.eq.s32.totalorder %s235_s17, 0  ;;  %p249_p2 = scmp.eq.s32.totalorder %s1743_s13, 1 }
   0x7   : > { %p254_p3 = scmp.ne.s32.totalorder %s1660_s10, %s1656_s30  ;;  %p255_p4 = scmp.eq.s32.totalorder %s1337_s14, 1 }
   0x8   : > { %s1758_s18 = scalar_select %p236_p1, %s1664_s11, %s238_s16  }
   0x9   : > { %p1760_p5 = por %p249_p2, %p248_p0  ;;  %p1764_p6 = por %p255_p4, %p254_p3 }
   0xa   : > { %p1340_p7 = scmp.ge.s32.totalorder %s1668_s12, 1  ;;  %p319_p8 = scmp.lt.s32.totalorder %s1668_s12, 3 }
   0xc   : > { %p320_p9 = pnand %p1340_p7, %p319_p8 }
   0xd   : > { %s1342_s25 = sshll.u32 (!%p320_p9), %s1743_s13, 2  ;;  %p374_p11 = scmp.lt.s32.totalorder (!%p320_p9), %s1743_s13, 1 }
   0xe   : > { %323 = sbr.rel (%p320_p9) target bundleno = 1524 (0x5f4), region = 56  ;;  %p369_p10 = scmp.lt.s32.totalorder (!%p320_p9), %s1342_s25, 7 }
   0xf   : > { %s365_s23 = sand.u32 (!%p320_p9), 1, %s1660_s10  }
  0x10   : > { %s1341_s24 = sshll.u32 (!%p320_p9), %s365_s23, 1 }
  0x11   : > { %s367_s17 = scalar_lea.vmem (!%p320_p9), [#allocation2], %s1341_s24 }
  0x13   : > { %v1370_v0 = vld [vmem:[%s2071_s4 + $0x18] sm:$0xf]  ;;  %v1460_v1 = vld [vmem:[%s2071_s4 + $0x20] sm:$0xf0]  ;;  %v1459_v2 = vld [vmem:[%s2071_s4 + $0x1c] sm:$0xf] }
  0x14   : > { %v1371_v3 = vor.u32 %v1460_v1, %v1370_v0  ;;  %v1372_v4 = vld [vmem:[%s2071_s4 + $0x24] sm:$0xf0]  ;;  %v1358_v5 = vld [vmem:[%s2071_s4] sm:$0xf]  ;;  %v1457_v6 = vld [vmem:[%s2071_s4 + $0x8] sm:$0xf0] }
  0x15   : > { %v1375_v7 = vor.u32 %v1459_v2, %v1372_v4  ;;  %v1456_v8 = vld [vmem:[%s2071_s4 + $0x4] sm:$0xf]  ;;  %v1360_v9 = vld [vmem:[%s2071_s4 + $0xc] sm:$0xf0]  ;;  %v1359_v10 = vor.u32 %v1457_v6, %v1358_v5  ;;  %s2084_s25 = smov (!%p369_p10, %s1342_s25), 7  ;;  %vm442_vm0 = vcmask 261120  }
  0x16   : > { %455 = vmatpush.bf16.msra.mxu0 %v1371_v3  ;;  %v1363_v11 = vor.u32 %v1456_v8, %v1360_v9  ;;  %s1343_s26 = sshll.u32 %s2084_s25, 2  ;;  %v1670_v19 = vmov 0   ;;  %v1378_v52 = vld [vmem:[%s2071_s4 + $0x20] sm:$0xf]  ;;  %v1461_v53 = vld [vmem:[%s2071_s4 + $0x28] sm:$0xf0] }
  0x17   : > { %474 = vmatpush.bf16.msra.mxu1 %v1375_v7  ;;  %s1798_s29 = scalar_lea.vmem %s2067_s0, %s1343_s26  ;;  %1535 = vset.pattern.permute.xlu0 %v1670_v19  ;;  %v1366_v54 = vld [vmem:[%s2071_s4 + $0x8] sm:$0xf]  ;;  %v1379_v55 = vor.u32 %v1461_v53, %v1378_v52  ;;  %v1458_v56 = vld [vmem:[%s2071_s4 + $0x10] sm:$0xf0] }
  0x18   : > { %v1801_v12 = vld [vmem:[%s1798_s29] sm:$0xff]  ;;  %v1808_v13 = vld [vmem:[%s1798_s29 + $0x8] sm:$0xff]  ;;  %s1816_s14 = scalar_select %p374_p11, %s1743_s13, 1  ;;  %1546 = vset.pattern.permute.xlu1 %v1670_v19  ;;  %1552 = vset.pattern.permute.xlu2 %v1670_v19  ;;  %v1367_v57 = vor.u32 %v1458_v56, %v1366_v54 }
  0x19   : > { %493 = vmatpush.bf16.msra.mxu2 %v1379_v55  ;;  %v1465_v55 = vld [vmem:[%s2072_s5 + $0x18] sm:$0xff] }
  0x1a   : > { %456 = vmatpush.bf16.msra.mxu0 %v1359_v10  ;;  %s1452_s16 = sshll.u32 %s1816_s14, 4  ;;  %s376_s25 = scalar_lea.vmem %s2068_s1, %s1816_s14 }
  0x1b   : > { %475 = vmatpush.bf16.msra.mxu1 %v1363_v11  ;;  %s381_s22 = scalar_lea.vmem %s2069_s2, %s1452_s16  ;;  %v553_v47 = vld [vmem:[%s376_s25] sm:$0x1]  ;;  %s386_s21 = scalar_lea.vmem %s2070_s3, %s1452_s16 }
  0x1c   : > { %v1477_v18 = vld [vmem:[%s381_s22] sm:$0xff]   ;;  %v1492_v24 = vld [vmem:[%s381_s22 + $0x8] sm:$0xff]   ;;  %v554_v48 = vunpack.c.l.bf16 %v553_v47  ;;  %s1449_s25 = sshll.u32 %s1743_s13, 1  ;;  %s1242_s13 = sshll.u32 %s367_s17, 4  ;;  %s1243_s13 = int_to_ptr.vmem [resolvable:$true] %s1242_s13 }
  0x1d   : > { %1380 = vmatmul.msk.bf16.vlgmr.msra.gmra.mxu0 %vm442_vm0, %v1801_v12  ;;  %v1478_v20 = vunpack.c.l.bf16 %v1477_v18  ;;  %v1479_v21 = vunpack.c.h.bf16 %v1477_v18  ;;  %v1482_v26 = vunpack.c.l.bf16 %v1492_v24  ;;  %v1483_v27 = vunpack.c.h.bf16 %v1492_v24  ;;  %494 = vmatpush.bf16.msra.mxu2 %v1367_v57  ;;  %v1464_v57 = vld [vmem:[%s2072_s5 + $0x10] sm:$0xff]  ;;  %s1240_s28 = scalar_lea.hbm %s2076_s9, %s1449_s25  ;;  %s1230_s14 = scalar_lea.sflag [#allocation3], %s365_s23 }
  0x1e   : > { %1382 = vmatmul.msk.bf16.vlgmr.msra.gmra.mxu1 %vm442_vm0, %v1801_v12  ;;  %v563_v51 = vperm.slane %v554_v48, 0  ;;  %v1467_v48 = vld [vmem:[%s2072_s5 + $0x28] sm:$0xff]  ;;  %s1626_s25 = scalar_lea.hbm %s2076_s9, 4 }
  0x1f   : > { %v1536_v25 = vpack.i.bf16 %v1479_v21, %v1478_v20  ;;  %v1541_v29 = vpack.i.bf16 %v1483_v27, %v1482_v26 }
  0x20   : > { %1384 = vmatmul.msk.bf16.vlgmr.msra.gmra.mxu2 %vm442_vm0, %v1801_v12 }
  0x21   : > { %1537 = vperm.xlu0 %1535, %v1536_v25  }
  0x29   : > { %1542 = vperm.xlu0 %1535, %v1541_v29  }
  0x2d   : > { %1381 = vmatmul.msk.bf16.gmra.mxu0 %vm442_vm0, %v1808_v13 }
  0x2e   : > { %1383 = vmatmul.msk.bf16.gmra.mxu1 %vm442_vm0, %v1808_v13 }
  0x30   : > { %1385 = vmatmul.msk.bf16.gmra.mxu2 %vm442_vm0, %v1808_v13 }
  0x93   : > { %v1538_v49 = vpop.permute.xlu0 %1537 }
  0x94   : > { %v1539_v50 = vunpack.i.l.bf16 %v1538_v49  ;;  %v1540_v61 = vunpack.i.h.bf16 %v1538_v49 }
  0x96   : > { %vm584_vm1 = vcmp.eq.f32.partialorder %v563_v51, %v1539_v50  ;;  %vm585_vm2 = vcmp.eq.f32.partialorder %v563_v51, %v1540_v61  ;;  %v1466_v50 = vld [vmem:[%s2072_s5 + $0x20] sm:$0xff] }
  0x9a   : > { %v458_v14 = vpop.f32.mrf.mxu0 }
  0x9b   : > { %v477_v15 = vpop.f32.mrf.mxu1  ;;  %v1543_v63 = vpop.permute.xlu0 %1542 }
  0x9c   : > { %v506_v37 = vpack.c.bf16 %v477_v15, %v458_v14  ;;  %v1544_v2 = vunpack.i.l.bf16 %v1543_v63  ;;  %v1545_v6 = vunpack.i.h.bf16 %v1543_v63 }
  0x9e   : > { %v526_v39 = vunpack.c.h.b16 %v506_v37  ;;  %v518_v42 = vunpack.c.l.b16 %v506_v37  ;;  %vm586_vm3 = vcmp.eq.f32.partialorder %v563_v51, %v1544_v2  ;;  %vm587_vm4 = vcmp.eq.f32.partialorder %v563_v51, %v1545_v6 }
  0xa2   : > { %v460_v16 = vpop.f32.mrf.mxu0 }
  0xa3   : > { %v479_v17 = vpop.f32.mrf.mxu1  ;;  %v496_v20 = vpop.f32.mrf.mxu2 }
  0xa4   : > { %v508_v35 = vpack.c.bf16 %v479_v17, %v460_v16 }
  0xa6   : > { %v527_v38 = vunpack.c.h.b16 %v508_v35  ;;  %v519_v41 = vunpack.c.l.b16 %v508_v35 }
  0xa8   : > { %v530_v40 = vpack.c.b16 %v527_v38, %v526_v39  ;;  %v522_v43 = vpack.c.b16 %v519_v41, %v518_v42 }
  0xaa   : > { %v463_v22 = vpop.f32.mrf.mxu0 }
  0xab   : > { %v482_v23 = vpop.f32.mrf.mxu1  ;;  %v498_v26 = vpop.f32.mrf.mxu2 }
  0xac   : > { %v510_v28 = vpack.c.bf16 %v482_v23, %v463_v22  ;;  %v509_v35 = vpack.c.bf16 %v498_v26, %v498_v26 }
  0xae   : > { %v528_v33 = vunpack.c.h.b16 %v510_v28  ;;  %v520_v45 = vunpack.c.l.b16 %v510_v28 }
  0xb2   : > { %v465_v30 = vpop.f32.mrf.mxu0 }
  0xb3   : > { %v484_v31 = vpop.f32.mrf.mxu1 }
  0xb4   : > { %v512_v32 = vpack.c.bf16 %v484_v31, %v465_v30  ;;  %v501_v30 = vpop.f32.mrf.mxu2 }
  0xb6   : > { %v529_v34 = vunpack.c.h.b16 %v512_v32  ;;  %v521_v44 = vunpack.c.l.b16 %v512_v32 }
  0xb8   : > { %v531_v36 = vpack.c.b16 %v529_v34, %v528_v33  ;;  %v523_v46 = vpack.c.b16 %v521_v44, %v520_v45  ;;  %v511_v33 = vpack.c.bf16 %v501_v30, %v501_v30  ;;  %v507_v34 = vpack.c.bf16 %v496_v20, %v496_v20  ;;  %v1469_v45 = vld [vmem:[%s2072_s5 + $0x38] sm:$0xff] }
  0xb9   : > { %741 = vmatpush.bf16.msrb.mxu1 %v1469_v45  ;;  %v1471_v45 = vld [vmem:[%s2073_s6 + $0x8] sm:$0xff] }
  0xba   : > { %540 = vmatpush.bf16.xpose.msra.mxu3 %v531_v36  ;;  %v644_v37 = vunpack.c.l.b16 %v511_v33  ;;  %v642_v39 = vunpack.c.l.b16 %v507_v34  ;;  %v1671_v34 = vmov 32.0   ;;  %915 = vmatpush.bf16.msrb.mxu2 %v1471_v45 }
  0xbc   : > { %v503_v36 = vpop.f32.mrf.mxu2 }
  0xbd   : > { %v513_v38 = vpack.c.bf16 %v503_v36, %v503_v36 }
  0xbf   : > { %v645_v41 = vunpack.c.l.b16 %v513_v38 }
  0xc1   : > { %v647_v42 = vpack.c.b16 %v645_v41, %v644_v37 }
  0xc2   : > { %541 = vmatpush.bf16.xpose.msra.mxu3 %v530_v40  ;;  %v643_v40 = vunpack.c.l.b16 %v509_v35 }
  0xc3   : > { %662 = vmatpush.bf16.msrb.mxu0 %v647_v42 }
  0xc9   : > { %542 = vmatmul.bf16.vlgmr.msra.gmra.mxu3 %v522_v43  ;;  %v646_v43 = vpack.c.b16 %v643_v40, %v642_v39 }
  0xcb   : > { %663 = vmatpush.bf16.msrb.mxu0 %v646_v43 }
  0xd9   : > { %547 = vmatmul.bf16.gmra.mxu3 %v523_v46  ;;  %v1468_v46 = vld [vmem:[%s2072_s5 + $0x30] sm:$0xff] }
  0xda   : > { %742 = vmatpush.bf16.msrb.mxu1 %v1468_v46 }
  0xde   : > { %743 = vmatpush.bf16.msrb.mxu1 %v1467_v48 }
  0xe2   : > { %744 = vmatpush.bf16.msrb.mxu1 %v1466_v50 }
  0xe6   : > { %745 = vmatpush.bf16.msrb.mxu1 %v1465_v55 }
  0xea   : > { %746 = vmatpush.bf16.msrb.mxu1 %v1464_v57 }
 0x14c   : > { %v543_v58 = vpop.f32.mrf.mxu3 }
 0x14d   : > { %v588_v59 = vsel %vm584_vm1, %v543_v58, -1e+09 }
 0x14e   : > { %v592_v60 = vsel %vm442_vm0, %v588_v59, -inf }
 0x14f   : > { %593 = vmax.xlane.f32.xlu1 %v592_v60 }
 0x154   : > { %v545_v62 = vpop.f32.mrf.mxu3 }
 0x155   : > { %v589_v0 = vsel %vm585_vm2, %v545_v62, -1e+09 }
 0x156   : > { %v595_v1 = vsel %vm442_vm0, %v589_v0, -inf }
 0x157   : > { %596 = vmax.xlane.f32.xlu1 %v595_v1  ;;  %v1462_v1 = vld [vmem:[%s2072_s5] sm:$0xff] }
 0x15c   : > { %v548_v3 = vpop.f32.mrf.mxu3 }
 0x15d   : > { %v590_v4 = vsel %vm586_vm3, %v548_v3, -1e+09  ;;  %vm998_vm3 = vcmask 523264  }
 0x15e   : > { %v598_v5 = vsel %vm442_vm0, %v590_v4, -inf }
 0x15f   : > { %599 = vmax.xlane.f32.xlu2 %v598_v5 }
 0x164   : > { %v550_v7 = vpop.f32.mrf.mxu3 }
 0x165   : > { %v591_v8 = vsel %vm587_vm4, %v550_v7, -1e+09  ;;  %vm1175_vm4 = vcmask 7168  }
 0x166   : > { %v601_v9 = vsel %vm442_vm0, %v591_v8, -inf }
 0x167   : > { %602 = vmax.xlane.f32.xlu2 %v601_v9 }
 0x1c2   : > { %v594_v10 = vpop.xlane.xlu1 %593 }
 0x1c3   : > { %v604_v11 = vsub.f32 %v588_v59, %v594_v10 }
 0x1c5   : > { %v608_v12 = vmul.f32 1.442695, %v604_v11 }
 0x1c7   : > { %1562 = vpow2.f32 %v608_v12 }
 0x1ca   : > { %v597_v14 = vpop.xlane.xlu1 %596 }
 0x1cb   : > { %v605_v15 = vsub.f32 %v589_v0, %v597_v14  ;;  %v1463_v0 = vld [vmem:[%s2072_s5 + $0x8] sm:$0xff] }
 0x1cc   : > { %747 = vmatpush.bf16.msrb.mxu1 %v1463_v0 }
 0x1cd   : > { %v1563_v16 = vpop.eup %1562  ;;  %v610_v17 = vmul.f32 1.442695, %v605_v15 }
 0x1ce   : > { %v616_v18 = vsel %vm442_vm0, %v1563_v16, 0.0 }
 0x1cf   : > { %1564 = vpow2.f32 %v610_v17  ;;  %617 = vadd.xlane.f32.xlu0 %v616_v18  ;;  %v390_v18 = vld [vmem:[%s1798_s29 + $0x8] sm:$0xff]  }
 0x1d0   : > { %748 = vmatpush.bf16.msrb.mxu1 %v1462_v1  ;;  %v766_v20 = vunpack.c.l.bf16 %v390_v18  ;;  %v767_v26 = vunpack.c.h.bf16 %v390_v18 }
 0x1d2   : > { %v600_v19 = vpop.xlane.xlu2 %599 }
 0x1d3   : > { %v606_v13 = vsub.f32 %v590_v4, %v600_v19 }
 0x1d5   : > { %v1565_v21 = vpop.eup %1564  ;;  %v612_v22 = vmul.f32 1.442695, %v606_v13 }
 0x1d6   : > { %v619_v23 = vsel %vm442_vm0, %v1565_v21, 0.0 }
 0x1d7   : > { %1566 = vpow2.f32 %v612_v22  ;;  %620 = vadd.xlane.f32.xlu1 %v619_v23 }
 0x1da   : > { %v603_v24 = vpop.xlane.xlu2 %602 }
 0x1db   : > { %v607_v25 = vsub.f32 %v591_v8, %v603_v24  ;;  %v388_v8 = vld [vmem:[%s1798_s29] sm:$0xff]  }
 0x1dc   : > { %v764_v9 = vunpack.c.l.bf16 %v388_v8  ;;  %v765_v14 = vunpack.c.h.bf16 %v388_v8 }
 0x1dd   : > { %v1567_v27 = vpop.eup %1566  ;;  %v614_v28 = vmul.f32 1.442695, %v607_v25 }
 0x1de   : > { %v622_v29 = vsel %vm442_vm0, %v1567_v27, 0.0 }
 0x1df   : > { %1568 = vpow2.f32 %v614_v28  ;;  %623 = vadd.xlane.f32.xlu2 %v622_v29 }
 0x1e5   : > { %v1569_v31 = vpop.eup %1568 }
 0x1e6   : > { %v625_v32 = vsel %vm442_vm0, %v1569_v31, 0.0 }
 0x1e7   : > { %626 = vadd.xlane.f32.xlu1 %v625_v32 }
 0x242   : > { %v618_v44 = vpop.xlane.xlu0 %617 }
 0x243   : > { %1570 = vrcp.f32 %v618_v44 }
 0x249   : > { %v1571_v49 = vpop.eup %1570 }
 0x24a   : > { %v621_v47 = vpop.xlane.xlu1 %620  ;;  %v632_v52 = vmul.f32 %v1571_v49, %v1563_v16  ;;  %v1470_v49 = vld [vmem:[%s2073_s6] sm:$0xff] }
 0x24b   : > { %1572 = vrcp.f32 %v621_v47  ;;  %916 = vmatpush.bf16.msrb.mxu2 %v1470_v49 }
 0x251   : > { %v1573_v51 = vpop.eup %1572 }
 0x252   : > { %v633_v53 = vmul.f32 %v1573_v51, %v1565_v21  ;;  %v624_v56 = vpop.xlane.xlu2 %623 }
 0x253   : > { %1574 = vrcp.f32 %v624_v56 }
 0x254   : > { %v636_v54 = vpack.c.bf16 %v633_v53, %v632_v52 }
 0x256   : > { %1386 = vmatmul.msk.bf16.vlgmr.msrb.gmra.mxu0 %vm442_vm0, %v636_v54 }
 0x259   : > { %v1575_v59 = vpop.eup %1574 }
 0x25a   : > { %v627_v58 = vpop.xlane.xlu1 %626  ;;  %v634_v61 = vmul.f32 %v1575_v59, %v1567_v27 }
 0x25b   : > { %1576 = vrcp.f32 %v627_v58 }
 0x25c   : > { %1578 = vrcp.f32 %v1671_v34 }
 0x261   : > { %v1577_v60 = vpop.eup %1576 }
 0x262   : > { %v635_v62 = vmul.f32 %v1577_v60, %v1569_v31  ;;  %v1579_v35 = vpop.eup %1578 }
 0x263   : > { %v785_v36 = vmul.f32 32.0, %v1579_v35  ;;  %vm789_vm5 = vweird.f32 %v1579_v35 }
 0x264   : > { %v637_v63 = vpack.c.bf16 %v635_v62, %v634_v61 }
 0x265   : > { %v786_v37 = vsub.f32 1.0, %v785_v36 }
 0x266   : > { %1387 = vmatmul.msk.bf16.gmra.mxu0 %vm442_vm0, %v637_v63 }
 0x267   : > { %v787_v38 = vmul.f32 %v1579_v35, %v786_v37 }
 0x269   : > { %v788_v39 = vadd.f32 %v1579_v35, %v787_v38 }
 0x26b   : > { %v1908_v41 = vsel %vm789_vm5, %v1579_v35, %v788_v39  ;;  %vm1203_vm5 = vcmask 1040384  }
 0x2d3   : > { %v665_v2 = vpop.f32.mrf.mxu0 }
 0x2db   : > { %v667_v3 = vpop.f32.mrf.mxu0 }
 0x2dc   : > { %v675_v4 = vpack.c.bf16 %v667_v3, %v665_v2 }
 0x2de   : > { %749 = vmatmul.bf16.vlgmr.msrb.gmra.mxu1 %v675_v4 }
 0x2e3   : > { %v670_v5 = vpop.f32.mrf.mxu0 }
 0x2eb   : > { %v672_v6 = vpop.f32.mrf.mxu0 }
 0x2ec   : > { %v676_v7 = vpack.c.bf16 %v672_v6, %v670_v5 }
 0x2ee   : > { %754 = vmatmul.bf16.gmra.mxu1 %v676_v7 }
 0x35b   : > { %v750_v10 = vpop.f32.mrf.mxu1 }
 0x35c   : > { %v1879_v11 = vadd.f32 %v764_v9, %v750_v10 }
 0x35e   : > { %v772_v12 = vsel %vm442_vm0, %v1879_v11, 0.0  ;;  %v795_v15 = vmul.f32 %v1879_v11, %v1879_v11 }
 0x35f   : > { %773 = vadd.xlane.f32.xlu2 %v772_v12 }
 0x360   : > { %v799_v13 = vsel %vm442_vm0, %v795_v15, 0.0 }
 0x363   : > { %v752_v16 = vpop.f32.mrf.mxu1 }
 0x364   : > { %v1885_v17 = vadd.f32 %v765_v14, %v752_v16 }
 0x366   : > { %v775_v19 = vsel %vm442_vm0, %v1885_v17, 0.0  ;;  %v796_v21 = vmul.f32 %v1885_v17, %v1885_v17 }
 0x367   : > { %776 = vadd.xlane.f32.xlu1 %v775_v19  ;;  %800 = vadd.xlane.f32.xlu2 %v799_v13 }
 0x368   : > { %v802_v24 = vsel %vm442_vm0, %v796_v21, 0.0 }
 0x36b   : > { %v755_v22 = vpop.f32.mrf.mxu1 }
 0x36c   : > { %v1893_v23 = vadd.f32 %v766_v20, %v755_v22 }
 0x36e   : > { %v778_v25 = vsel %vm442_vm0, %v1893_v23, 0.0  ;;  %v797_v27 = vmul.f32 %v1893_v23, %v1893_v23 }
 0x36f   : > { %803 = vadd.xlane.f32.xlu1 %v802_v24  ;;  %779 = vadd.xlane.f32.xlu2 %v778_v25  ;;  %v1558_v25 = vld [vmem:[%s2075_s8] ss:$0 sm:$0xff] }
 0x370   : > { %v805_v31 = vsel %vm442_vm0, %v797_v27, 0.0 }
 0x373   : > { %v757_v28 = vpop.f32.mrf.mxu1 }
 0x374   : > { %v1900_v29 = vadd.f32 %v767_v26, %v757_v28 }
 0x376   : > { %v781_v30 = vsel %vm442_vm0, %v1900_v29, 0.0  ;;  %v798_v32 = vmul.f32 %v1900_v29, %v1900_v29 }
 0x377   : > { %782 = vadd.xlane.f32.xlu1 %v781_v30  ;;  %806 = vadd.xlane.f32.xlu2 %v805_v31 }
 0x378   : > { %v808_v33 = vsel %vm442_vm0, %v798_v32, 0.0 }
 0x37f   : > { %809 = vadd.xlane.f32.xlu1 %v808_v33  ;;  %v1559_v33 = vld [vmem:[%s2075_s8 + $0x1] ss:$0 sm:$0xff] }
 0x3d2   : > { %v774_v40 = vpop.xlane.xlu2 %773 }
 0x3d3   : > { %v791_v42 = vmul.f32 %v1908_v41, %v774_v40 }
 0x3d5   : > { %v815_v46 = vmul.f32 %v791_v42, %v791_v42  ;;  %v823_v19 = vsub.f32 %v1879_v11, %v791_v42 }
 0x3da   : > { %v777_v43 = vpop.xlane.xlu1 %776  ;;  %v801_v44 = vpop.xlane.xlu2 %800 }
 0x3db   : > { %v811_v47 = vmul.f32 %v801_v44, %v1908_v41  ;;  %v792_v50 = vmul.f32 %v1908_v41, %v777_v43 }
 0x3dd   : > { %v819_v48 = vsub.f32 %v811_v47, %v815_v46  ;;  %v816_v54 = vmul.f32 %v792_v50, %v792_v50  ;;  %v824_v28 = vsub.f32 %v1885_v17, %v792_v50 }
 0x3df   : > { %v827_v51 = vadd.f32 1e-05, %v819_v48 }
 0x3e1   : > { %1580 = vrsqrt.f32 %v827_v51  ;;  %vm837_vm7 = vweird.f32 %v827_v51 }
 0x3e2   : > { %v804_v52 = vpop.xlane.xlu1 %803  ;;  %v780_v53 = vpop.xlane.xlu2 %779 }
 0x3e3   : > { %v812_v55 = vmul.f32 %v804_v52, %v1908_v41  ;;  %v1921_v59 = vmul.f32 %v1908_v41, %v780_v53 }
 0x3e5   : > { %v820_v56 = vsub.f32 %v812_v55, %v816_v54  ;;  %v817_v0 = vmul.f32 %v1921_v59, %v1921_v59  ;;  %v825_v46 = vsub.f32 %v1893_v23, %v1921_v59  ;;  %v1475_v23 = vld [vmem:[%s2074_s7 + $0x18] sm:$0xff]  ;;  %v1472_v59 = vld [vmem:[%s2074_s7] sm:$0xff] }
 0x3e6   : > { %1009 = vmatpush.bf16.msrb.mxu3 %v1475_v23 }
 0x3e7   : > { %v1581_v57 = vpop.eup %1580  ;;  %v828_v58 = vadd.f32 1e-05, %v820_v56 }
 0x3e8   : > { %v832_v60 = vmul.f32 %v1581_v57, %v827_v51  ;;  %vm838_vm6 = vweird.f32 %v1581_v57 }
 0x3e9   : > { %1582 = vrsqrt.f32 %v828_v58  ;;  %vm839_vm8 = vmor %vm837_vm7, %vm838_vm6  ;;  %vm847_vm10 = vweird.f32 %v828_v58 }
 0x3ea   : > { %v833_v61 = vmul.f32 %v1581_v57, %v832_v60  ;;  %v783_v62 = vpop.xlane.xlu1 %782  ;;  %v807_v63 = vpop.xlane.xlu2 %806 }
 0x3eb   : > { %v813_v1 = vmul.f32 %v807_v63, %v1908_v41  ;;  %v794_v6 = vmul.f32 %v1908_v41, %v783_v62 }
 0x3ec   : > { %v834_v2 = vmul.f32 0.5, %v833_v61 }
 0x3ed   : > { %v821_v3 = vsub.f32 %v813_v1, %v817_v0  ;;  %v818_v14 = vmul.f32 %v794_v6, %v794_v6  ;;  %v826_v50 = vsub.f32 %v1900_v29, %v794_v6  ;;  %v1474_v29 = vld [vmem:[%s2074_s7 + $0x10] sm:$0xff] }
 0x3ee   : > { %v835_v4 = vsub.f32 1.5, %v834_v2  ;;  %1010 = vmatpush.bf16.msrb.mxu3 %v1474_v29 }
 0x3ef   : > { %v1583_v5 = vpop.eup %1582  ;;  %v829_v7 = vadd.f32 1e-05, %v821_v3 }
 0x3f0   : > { %v836_v8 = vmul.f32 %v1581_v57, %v835_v4  ;;  %v842_v9 = vmul.f32 %v1583_v5, %v828_v58  ;;  %vm848_vm9 = vweird.f32 %v1583_v5  ;;  %v1473_v58 = vld [vmem:[%s2074_s7 + $0x8] sm:$0xff] }
 0x3f1   : > { %1584 = vrsqrt.f32 %v829_v7  ;;  %vm849_vm11 = vmor %vm847_vm10, %vm848_vm9  ;;  %vm857_vm13 = vweird.f32 %v829_v7 }
 0x3f2   : > { %v843_v10 = vmul.f32 %v1583_v5, %v842_v9  ;;  %v810_v12 = vpop.xlane.xlu1 %809  ;;  %v840_v16 = vsel %vm839_vm8, %v1581_v57, %v836_v8  ;;  %1011 = vmatpush.bf16.msrb.mxu3 %v1473_v58 }
 0x3f3   : > { %v814_v15 = vmul.f32 %v810_v12, %v1908_v41  ;;  %v871_v22 = vmul.f32 %v840_v16, %v823_v19 }
 0x3f4   : > { %v844_v18 = vmul.f32 0.5, %v843_v10 }
 0x3f5   : > { %v822_v13 = vsub.f32 %v814_v15, %v818_v14  ;;  %v876_v32 = vmul.f32 %v1558_v25, %v871_v22 }
 0x3f6   : > { %v845_v20 = vsub.f32 1.5, %v844_v18  ;;  %1012 = vmatpush.bf16.msrb.mxu3 %v1472_v59 }
 0x3f7   : > { %v1585_v21 = vpop.eup %1584  ;;  %v830_v24 = vadd.f32 1e-05, %v822_v13  ;;  %v1936_v38 = vadd.f32 %v1559_v33, %v876_v32 }
 0x3f8   : > { %v846_v26 = vmul.f32 %v1583_v5, %v845_v20  ;;  %v852_v27 = vmul.f32 %v1585_v21, %v829_v7  ;;  %vm858_vm12 = vweird.f32 %v1585_v21 }
 0x3f9   : > { %1586 = vrsqrt.f32 %v830_v24  ;;  %vm859_vm14 = vmor %vm857_vm13, %vm858_vm12  ;;  %vm867_vm1 = vweird.f32 %v830_v24 }
 0x3fa   : > { %v850_v30 = vsel %vm849_vm11, %v1583_v5, %v846_v26  ;;  %v853_v31 = vmul.f32 %v1585_v21, %v852_v27 }
 0x3fb   : > { %v872_v11 = vmul.f32 %v850_v30, %v824_v28 }
 0x3fc   : > { %v854_v34 = vmul.f32 0.5, %v853_v31 }
 0x3fd   : > { %v877_v35 = vmul.f32 %v1558_v25, %v872_v11 }
 0x3fe   : > { %v855_v36 = vsub.f32 1.5, %v854_v34 }
 0x3ff   : > { %v1587_v37 = vpop.eup %1586  ;;  %v1938_v39 = vadd.f32 %v1559_v33, %v877_v35 }
 0x400   : > { %v856_v40 = vmul.f32 %v1585_v21, %v855_v36  ;;  %v862_v17 = vmul.f32 %v1587_v37, %v830_v24  ;;  %vm868_vm15 = vweird.f32 %v1587_v37 }
 0x401   : > { %v885_v42 = vpack.c.bf16 %v1938_v39, %v1936_v38  ;;  %vm869_vm2 = vmor %vm867_vm1, %vm868_vm15 }
 0x402   : > { %v863_v43 = vmul.f32 %v1587_v37, %v862_v17  ;;  %v860_v44 = vsel %vm859_vm14, %v1585_v21, %v856_v40 }
 0x403   : > { %1428 = vmatmul.msk.bf16.vlgmr.msrb.gmra.mxu2 %vm442_vm0, %v885_v42  ;;  %v873_v48 = vmul.f32 %v860_v44, %v825_v46 }
 0x404   : > { %v864_v45 = vmul.f32 0.5, %v863_v43 }
 0x405   : > { %v878_v53 = vmul.f32 %v1558_v25, %v873_v48 }
 0x406   : > { %v865_v47 = vsub.f32 1.5, %v864_v45 }
 0x407   : > { %v1946_v55 = vadd.f32 %v1559_v33, %v878_v53 }
 0x408   : > { %v866_v49 = vmul.f32 %v1587_v37, %v865_v47  ;;  %v1493_v47 = vld [vmem:[%s386_s21 + $0x8] sm:$0xff]  }
 0x40a   : > { %v870_v51 = vsel %vm869_vm2, %v1587_v37, %v866_v49  ;;  %v1485_v49 = vld [vmem:[%s386_s21] sm:$0xff]   ;;  %s1244_s21 = sshll.u32 %s1240_s28, 4  ;;  %s1245_s21 = int_to_ptr.hbm [resolvable:$true] %s1244_s21 }
 0x40b   : > { %v874_v52 = vmul.f32 %v870_v51, %v826_v50  ;;  %v1490_v50 = vunpack.c.l.bf16 %v1493_v47  ;;  %v1487_v53 = vunpack.c.h.bf16 %v1485_v49  ;;  %s1620_s16 = sshra.s32 %s1245_s21, 4  ;;  %s1621_s16 = int_to_ptr.hbm [resolvable:$true] %s1620_s16 }
 0x40c   : > { %s1622_s22 = scalar_lea.hbm %s1621_s16, 2  ;;  %p1627_p1 = scmp.lt.s32.totalorder %s1621_s16, %s2076_s9 }
 0x40d   : > { %v879_v54 = vmul.f32 %v1558_v25, %v874_v52  ;;  %v1486_v52 = vunpack.c.l.bf16 %v1485_v49  ;;  %v1194_v23 = vsel %vm1175_vm4, %v1490_v50, 0.0  ;;  %v1177_v58 = vsel %vm1175_vm4, %v1487_v53, 0.0  ;;  %p1623_p12 = scmp.ne.s32.totalorder %s1621_s16, %s1622_s22  ;;  %p1628_p2 = scmp.lt.s32.totalorder %s1626_s25, %s1622_s22 }
 0x40f   : > { %v1948_v56 = vadd.f32 %v1559_v33, %v879_v54  ;;  %v1176_v59 = vsel %vm1175_vm4, %v1486_v52, 0.0  ;;  %p1624_p13 = pnand %p1623_p12, %p1760_p5  ;;  %p1629_p3 = por %p1628_p2, %p1627_p1 }
 0x411   : > { %v886_v57 = vpack.c.bf16 %v1948_v56, %v1946_v55  ;;  %p1625_p0 = pneg %p1624_p13 }
 0x413   : > { %1429 = vmatmul.msk.bf16.gmra.mxu2 %vm442_vm0, %v886_v57  ;;  %p1630_p4 = pnand %p1629_p3, %p1625_p0 }
 0x486   : > { %v918_v60 = vpop.f32.mrf.mxu2 }
 0x487   : > { %v928_v61 = vmul.f32 %v918_v60, %v918_v60 }
 0x489   : > { %v932_v62 = vmul.f32 %v928_v61, %v918_v60 }
 0x48b   : > { %v936_v63 = vmul.f32 0.044715, %v932_v62 }
 0x48d   : > { %v940_v0 = vadd.f32 %v936_v63, %v918_v60  ;;  %v1178_v63 = vadd.f32 %v1177_v58, %v1176_v59 }
 0x48e   : > { %v920_v1 = vpop.f32.mrf.mxu2 }
 0x48f   : > { %v944_v2 = vmul.f32 0.7978846, %v940_v0  ;;  %v929_v3 = vmul.f32 %v920_v1, %v920_v1 }
 0x491   : > { %v933_v4 = vmul.f32 %v929_v3, %v920_v1  ;;  %1588 = vtanh.f32 %v944_v2  ;;  %v1179_v3 = vrot.slane %v1178_v63, 4 }
 0x493   : > { %v937_v5 = vmul.f32 0.044715, %v933_v4 }
 0x495   : > { %v941_v6 = vadd.f32 %v937_v5, %v920_v1 }
 0x496   : > { %v923_v7 = vpop.f32.mrf.mxu2 }
 0x497   : > { %v945_v8 = vmul.f32 0.7978846, %v941_v6  ;;  %v930_v9 = vmul.f32 %v923_v7, %v923_v7  ;;  %v1589_v10 = vpop.eup %1588  ;;  %v1180_v6 = vadd.f32 %v1179_v3, %v1178_v63 }
 0x498   : > { %v952_v15 = vadd.f32 1.0, %v1589_v10 }
 0x499   : > { %1590 = vtanh.f32 %v945_v8  ;;  %v934_v12 = vmul.f32 %v930_v9, %v923_v7  ;;  %v1181_v10 = vrot.slane %v1180_v6, 2 }
 0x49a   : > { %v956_v21 = vmul.f32 0.5, %v952_v15 }
 0x49b   : > { %v938_v14 = vmul.f32 0.044715, %v934_v12 }
 0x49c   : > { %v960_v27 = vmul.f32 %v956_v21, %v918_v60 }
 0x49d   : > { %v942_v16 = vadd.f32 %v938_v14, %v923_v7 }
 0x49e   : > { %v925_v18 = vpop.f32.mrf.mxu2 }
 0x49f   : > { %v1591_v19 = vpop.eup %1590  ;;  %v946_v13 = vmul.f32 0.7978846, %v942_v16  ;;  %v931_v20 = vmul.f32 %v925_v18, %v925_v18  ;;  %v1182_v16 = vadd.f32 %v1181_v10, %v1180_v6 }
 0x4a0   : > { %v953_v22 = vadd.f32 1.0, %v1591_v19 }
 0x4a1   : > { %v935_v24 = vmul.f32 %v931_v20, %v925_v18  ;;  %1592 = vtanh.f32 %v946_v13  ;;  %v1183_v19 = vrot.slane %v1182_v16, 1 }
 0x4a2   : > { %v957_v25 = vmul.f32 0.5, %v953_v22 }
 0x4a3   : > { %v939_v26 = vmul.f32 0.044715, %v935_v24  ;;  %v1184_v20 = vadd.f32 %v1183_v19, %v1182_v16 }
 0x4a4   : > { %v961_v28 = vmul.f32 %v957_v25, %v920_v1 }
 0x4a5   : > { %v943_v30 = vadd.f32 %v939_v26, %v925_v18 }
 0x4a6   : > { %v964_v31 = vpack.c.bf16 %v961_v28, %v960_v27 }
 0x4a7   : > { %v947_v11 = vmul.f32 0.7978846, %v943_v30  ;;  %v1593_v32 = vpop.eup %1592 }
 0x4a8   : > { %1446 = vmatmul.msk.bf16.vlgmr.msrb.gmra.mxu3 %vm998_vm3, %v964_v31  ;;  %v954_v33 = vadd.f32 1.0, %v1593_v32 }
 0x4a9   : > { %1594 = vtanh.f32 %v947_v11 }
 0x4aa   : > { %v958_v35 = vmul.f32 0.5, %v954_v33 }
 0x4ac   : > { %v962_v40 = vmul.f32 %v958_v35, %v923_v7 }
 0x4af   : > { %v1595_v34 = vpop.eup %1594 }
 0x4b0   : > { %v955_v36 = vadd.f32 1.0, %v1595_v34 }
 0x4b2   : > { %v959_v37 = vmul.f32 0.5, %v955_v36 }
 0x4b4   : > { %v963_v17 = vmul.f32 %v959_v37, %v925_v18 }
 0x4b6   : > { %v965_v42 = vpack.c.bf16 %v963_v17, %v962_v40 }
 0x4b8   : > { %1447 = vmatmul.msk.bf16.gmra.mxu3 %vm998_vm3, %v965_v42 }
 0x52b   : > { %v1014_v43 = vpop.f32.mrf.mxu3 }
 0x52c   : > { %v1966_v44 = vadd.f32 %v1014_v43, %v1936_v38  ;;  %v1491_v38 = vunpack.c.h.bf16 %v1493_v47 }
 0x52e   : > { %v1028_v45 = vsel %vm442_vm0, %v1966_v44, 0.0  ;;  %v1044_v46 = vmul.f32 %v1966_v44, %v1966_v44  ;;  %v1195_v29 = vsel %vm1175_vm4, %v1491_v38, 0.0  ;;  %v1553_v25 = vpack.i.bf16 %v1491_v38, %v1490_v50 }
 0x52f   : > { %1029 = vadd.xlane.f32.xlu2 %v1028_v45  ;;  %v1196_v62 = vadd.f32 %v1195_v29, %v1194_v23 }
 0x530   : > { %v1048_v48 = vsel %vm442_vm0, %v1044_v46, 0.0 }
 0x531   : > { %1049 = vadd.xlane.f32.xlu0 %v1048_v48  ;;  %v1197_v1 = vrot.slane %v1196_v62, 4 }
 0x533   : > { %v1016_v51 = vpop.f32.mrf.mxu3  ;;  %v1198_v7 = vadd.f32 %v1197_v1, %v1196_v62 }
 0x534   : > { %v1979_v54 = vadd.f32 %v1016_v51, %v1938_v39 }
 0x535   : > { %v1199_v12 = vrot.slane %v1198_v7, 2 }
 0x536   : > { %v1045_v57 = vmul.f32 %v1979_v54, %v1979_v54  ;;  %v1031_v61 = vsel %vm442_vm0, %v1979_v54, 0.0 }
 0x537   : > { %v1200_v18 = vadd.f32 %v1199_v12, %v1198_v7 }
 0x538   : > { %v1051_v60 = vsel %vm442_vm0, %v1045_v57, 0.0 }
 0x539   : > { %1052 = vadd.xlane.f32.xlu1 %v1051_v60  ;;  %1032 = vadd.xlane.f32.xlu0 %v1031_v61  ;;  %v1201_v13 = vrot.slane %v1200_v18, 1 }
 0x53b   : > { %v1019_v0 = vpop.f32.mrf.mxu3  ;;  %v1202_v21 = vadd.f32 %v1201_v13, %v1200_v18 }
 0x53c   : > { %v1987_v39 = vadd.f32 %v1019_v0, %v1946_v55 }
 0x53d   : > { %v1205_v22 = vsel %vm1203_vm5, %v1184_v20, %v1202_v21 }
 0x53e   : > { %v1046_v2 = vmul.f32 %v1987_v39, %v1987_v39  ;;  %v1034_v5 = vsel %vm442_vm0, %v1987_v39, 0.0  ;;  %v1206_v24 = vmax.f32 %v1205_v22, 1e-09 }
 0x540   : > { %v1054_v4 = vsel %vm442_vm0, %v1046_v2, 0.0 }
 0x541   : > { %1055 = vadd.xlane.f32.xlu2 %v1054_v4  ;;  %1035 = vadd.xlane.f32.xlu1 %v1034_v5 }
 0x543   : > { %v1021_v8 = vpop.f32.mrf.mxu3 }
 0x544   : > { %v1995_v9 = vadd.f32 %v1021_v8, %v1948_v56  ;;  %v1547_v56 = vpack.i.bf16 %v1487_v53, %v1486_v52 }
 0x546   : > { %v1047_v55 = vmul.f32 %v1995_v9, %v1995_v9  ;;  %v1037_v15 = vsel %vm442_vm0, %v1995_v9, 0.0 }
 0x548   : > { %v1057_v14 = vsel %vm442_vm0, %v1047_v55, 0.0 }
 0x549   : > { %1058 = vadd.xlane.f32.xlu0 %v1057_v14  ;;  %1038 = vadd.xlane.f32.xlu2 %v1037_v15 }
 0x55a   : > { %1548 = vperm.xlu1 %1546, %v1547_v56  }
 0x55d   : > { %1209 = vperm.xlu0 %1535, %v1206_v24  }
 0x561   : > { %1554 = vperm.xlu2 %1552, %v1553_v25  }
 0x5a2   : > { %v1030_v26 = vpop.xlane.xlu2 %1029 }
 0x5a3   : > { %v1040_v27 = vmul.f32 %v1030_v26, %v1908_v41 }
 0x5a4   : > { %v1050_v28 = vpop.xlane.xlu0 %1049 }
 0x5a5   : > { %v1064_v30 = vmul.f32 %v1040_v27, %v1040_v27  ;;  %v1060_v31 = vmul.f32 %v1050_v28, %v1908_v41  ;;  %v1072_v5 = vsub.f32 %v1966_v44, %v1040_v27  ;;  %v1561_v44 = vld [vmem:[%s2075_s8 + $0x3] ss:$0 sm:$0xff] }
 0x5a7   : > { %v1068_v11 = vsub.f32 %v1060_v31, %v1064_v30 }
 0x5a9   : > { %v1076_v32 = vadd.f32 1e-05, %v1068_v11 }
 0x5ab   : > { %1596 = vrsqrt.f32 %v1076_v32  ;;  %vm1086_vm7 = vweird.f32 %v1076_v32 }
 0x5ac   : > { %v1053_v33 = vpop.xlane.xlu1 %1052  ;;  %v1033_v34 = vpop.xlane.xlu0 %1032 }
 0x5ad   : > { %v1041_v35 = vmul.f32 %v1033_v34, %v1908_v41  ;;  %v1061_v36 = vmul.f32 %v1053_v33, %v1908_v41 }
 0x5af   : > { %v1065_v37 = vmul.f32 %v1041_v35, %v1041_v35  ;;  %v1073_v55 = vsub.f32 %v1979_v54, %v1041_v35 }
 0x5b1   : > { %v1597_v40 = vpop.eup %1596  ;;  %v1069_v17 = vsub.f32 %v1061_v36, %v1065_v37 }
 0x5b2   : > { %v1081_v42 = vmul.f32 %v1597_v40, %v1076_v32  ;;  %vm1087_vm6 = vweird.f32 %v1597_v40 }
 0x5b3   : > { %v1077_v43 = vadd.f32 1e-05, %v1069_v17  ;;  %vm1088_vm8 = vmor %vm1086_vm7, %vm1087_vm6  ;;  %vm1227_vm7 = vcmask 254976  }
 0x5b4   : > { %v1082_v45 = vmul.f32 %v1597_v40, %v1081_v42  ;;  %v1036_v46 = vpop.xlane.xlu1 %1035  ;;  %v1056_v47 = vpop.xlane.xlu2 %1055 }
 0x5b5   : > { %1598 = vrsqrt.f32 %v1077_v43  ;;  %v1042_v48 = vmul.f32 %v1036_v46, %v1908_v41  ;;  %v1062_v38 = vmul.f32 %v1056_v47, %v1908_v41  ;;  %vm1096_vm10 = vweird.f32 %v1077_v43 }
 0x5b6   : > { %v1083_v49 = vmul.f32 0.5, %v1082_v45 }
 0x5b7   : > { %v1066_v50 = vmul.f32 %v1042_v48, %v1042_v48  ;;  %v1074_v20 = vsub.f32 %v1987_v39, %v1042_v48 }
 0x5b8   : > { %v1084_v52 = vsub.f32 1.5, %v1083_v49 }
 0x5b9   : > { %v1070_v51 = vsub.f32 %v1062_v38, %v1066_v50 }
 0x5ba   : > { %v1085_v60 = vmul.f32 %v1597_v40, %v1084_v52 }
 0x5bb   : > { %v1599_v53 = vpop.eup %1598  ;;  %v1078_v57 = vadd.f32 1e-05, %v1070_v51 }
 0x5bc   : > { %v1091_v23 = vmul.f32 %v1599_v53, %v1077_v43  ;;  %v1059_v29 = vpop.xlane.xlu0 %1058  ;;  %v1039_v58 = vpop.xlane.xlu2 %1038  ;;  %vm1097_vm9 = vweird.f32 %v1599_v53  ;;  %v1089_v3 = vsel %vm1088_vm8, %v1597_v40, %v1085_v60 }
 0x5bd   : > { %1600 = vrsqrt.f32 %v1078_v57  ;;  %v2010_v59 = vmul.f32 %v1039_v58, %v1908_v41  ;;  %v1063_v62 = vmul.f32 %v1059_v29, %v1908_v41  ;;  %vm1098_vm11 = vmor %vm1096_vm10, %vm1097_vm9  ;;  %v1560_v41 = vld [vmem:[%s2075_s8 + $0x2] ss:$0 sm:$0xff]  ;;  %v1120_v10 = vmul.f32 %v1089_v3, %v1072_v5 }
 0x5be   : > { %v1092_v61 = vmul.f32 %v1599_v53, %v1091_v23  ;;  %vm1106_vm13 = vweird.f32 %v1078_v57 }
 0x5bf   : > { %v1067_v63 = vmul.f32 %v2010_v59, %v2010_v59  ;;  %v1125_v19 = vmul.f32 %v1560_v41, %v1120_v10  ;;  %v1075_v43 = vsub.f32 %v1995_v9, %v2010_v59 }
 0x5c0   : > { %v1093_v0 = vmul.f32 0.5, %v1092_v61 }
 0x5c1   : > { %v1071_v1 = vsub.f32 %v1063_v62, %v1067_v63  ;;  %v1130_v27 = vadd.f32 %v1561_v44, %v1125_v19 }
 0x5c2   : > { %v1094_v2 = vsub.f32 1.5, %v1093_v0 }
 0x5c3   : > { %v1601_v4 = vpop.eup %1600  ;;  %v1079_v6 = vadd.f32 1e-05, %v1071_v1 }
 0x5c4   : > { %v1095_v7 = vmul.f32 %v1599_v53, %v1094_v2  ;;  %v1101_v8 = vmul.f32 %v1601_v4, %v1078_v57  ;;  %vm1107_vm12 = vweird.f32 %v1601_v4  ;;  %v1555_v42 = vpop.permute.xlu2 %1554 }
 0x5c5   : > { %1602 = vrsqrt.f32 %v1079_v6  ;;  %vm1108_vm14 = vmor %vm1106_vm13, %vm1107_vm12  ;;  %vm1116_vm1 = vweird.f32 %v1079_v6  ;;  %v1556_v48 = vunpack.i.l.bf16 %v1555_v42  ;;  %v1557_v51 = vunpack.i.h.bf16 %v1555_v42 }
 0x5c6   : > { %v1099_v12 = vsel %vm1098_vm11, %v1599_v53, %v1095_v7  ;;  %v1102_v14 = vmul.f32 %v1601_v4, %v1101_v8 }
 0x5c7   : > { %v1121_v15 = vmul.f32 %v1099_v12, %v1073_v55 }
 0x5c8   : > { %v1103_v16 = vmul.f32 0.5, %v1102_v14 }
 0x5c9   : > { %v1126_v18 = vmul.f32 %v1560_v41, %v1121_v15 }
 0x5ca   : > { %v1104_v13 = vsub.f32 1.5, %v1103_v16 }
 0x5cb   : > { %v1603_v54 = vpop.eup %1602  ;;  %v1131_v24 = vadd.f32 %v1561_v44, %v1126_v18 }
 0x5cc   : > { %v1105_v21 = vmul.f32 %v1601_v4, %v1104_v13  ;;  %v1111_v56 = vmul.f32 %v1603_v54, %v1079_v6  ;;  %v1549_v22 = vpop.permute.xlu1 %1548  ;;  %vm1117_vm15 = vweird.f32 %v1603_v54 }
 0x5cd   : > { %v1551_v25 = vunpack.i.h.bf16 %v1549_v22  ;;  %v1550_v26 = vunpack.i.l.bf16 %v1549_v22  ;;  %vm1118_vm2 = vmor %vm1116_vm1, %vm1117_vm15 }
 0x5ce   : > { %v1112_v28 = vmul.f32 %v1603_v54, %v1111_v56  ;;  %v1109_v30 = vsel %vm1108_vm14, %v1601_v4, %v1105_v21 }
 0x5cf   : > { %v1163_v31 = vmul.f32 %v1551_v25, %v1131_v24  ;;  %v1162_v11 = vmul.f32 %v1550_v26, %v1130_v27  ;;  %v1210_v32 = vpop.permute.xlu0 %1209  ;;  %v1122_v33 = vmul.f32 %v1109_v30, %v1074_v20 }
 0x5d0   : > { %v1113_v34 = vmul.f32 0.5, %v1112_v28  ;;  %1604 = vrcp.f32 %v1210_v32  ;;  %v1223_v5 = vand.u32 2147483648, %v1210_v32  ;;  %vm1217_vm4 = vweird.f32 %v1210_v32 }
 0x5d1   : > { %v1167_v35 = vsel %vm442_vm0, %v1163_v31, 0.0  ;;  %v1166_v39 = vsel %vm442_vm0, %v1162_v11, 0.0  ;;  %v1127_v37 = vmul.f32 %v1560_v41, %v1122_v33  ;;  %v1221_v7 = vand.u32 2147483647, %v1210_v32 }
 0x5d2   : > { %v1114_v36 = vsub.f32 1.5, %v1113_v34  ;;  %v1168_v17 = vadd.f32 %v1167_v35, %v1166_v39  ;;  %v1224_v10 = vor.u32 1.1754944e-38, %v1223_v5 }
 0x5d3   : > { %v1132_v47 = vadd.f32 %v1561_v44, %v1127_v37  ;;  %vm1222_vm6 = vcmp.eq.f32.partialorder %v1221_v7, 8.507059e+37 }
 0x5d4   : > { %v1115_v40 = vmul.f32 %v1603_v54, %v1114_v36  ;;  %v1169_v50 = vrot.slane %v1168_v17, 4 }
 0x5d5   : > { %v1164_v57 = vmul.f32 %v1556_v48, %v1132_v47 }
 0x5d6   : > { %v1119_v45 = vsel %vm1118_vm2, %v1603_v54, %v1115_v40  ;;  %v1605_v49 = vpop.eup %1604  ;;  %v1170_v23 = vadd.f32 %v1169_v50, %v1168_v17 }
 0x5d7   : > { %v1123_v46 = vmul.f32 %v1119_v45, %v1075_v43  ;;  %v1213_v52 = vmul.f32 %v1605_v49, %v1210_v32  ;;  %v1185_v59 = vsel %vm442_vm0, %v1164_v57, 0.0  ;;  %vm1218_vm3 = vweird.f32 %v1605_v49 }
 0x5d8   : > { %v1171_v60 = vrot.slane %v1170_v23, 2 }
 0x5d9   : > { %v1128_v38 = vmul.f32 %v1560_v41, %v1123_v46  ;;  %v1214_v58 = vsub.f32 1.0, %v1213_v52 }
 0x5da   : > { %v1172_v0 = vadd.f32 %v1171_v60, %v1170_v23 }
 0x5db   : > { %v1133_v53 = vadd.f32 %v1561_v44, %v1128_v38  ;;  %v1215_v63 = vmul.f32 %v1605_v49, %v1214_v58 }
 0x5dc   : > { %v1173_v4 = vrot.slane %v1172_v0, 1 }
 0x5dd   : > { %v1165_v29 = vmul.f32 %v1557_v51, %v1133_v53  ;;  %v1216_v3 = vadd.f32 %v1605_v49, %v1215_v63 }
 0x5de   : > { %v1174_v41 = vadd.f32 %v1173_v4, %v1172_v0 }
 0x5df   : > { %v1186_v9 = vsel %vm442_vm0, %v1165_v29, 0.0  ;;  %vm1219_vm0 = vmor %vm1217_vm4, %vm1218_vm3 }
 0x5e0   : > { %v1187_v61 = vadd.f32 %v1186_v9, %v1185_v59  ;;  %v1220_v55 = vsel %vm1219_vm0, %v1605_v49, %v1216_v3 }
 0x5e1   : > { %v1225_v14 = vsel %vm1222_vm6, %v1224_v10, %v1220_v55 }
 0x5e2   : > { %v1188_v62 = vrot.slane %v1187_v61, 4 }
 0x5e4   : > { %v1189_v1 = vadd.f32 %v1188_v62, %v1187_v61 }
 0x5e6   : > { %v1190_v2 = vrot.slane %v1189_v1, 2 }
 0x5e8   : > { %v1191_v6 = vadd.f32 %v1190_v2, %v1189_v1 }
 0x5ea   : > { %v1192_v8 = vrot.slane %v1191_v6, 1 }
 0x5ec   : > { %v1193_v12 = vadd.f32 %v1192_v8, %v1191_v6 }
 0x5ee   : > { %v1204_v15 = vsel %vm1203_vm5, %v1174_v41, %v1193_v12 }
 0x5ef   : > { %v1226_v16 = vmul.f32 %v1225_v14, %v1204_v15 }
 0x5f1   : > { %1228 = vst.msk [vmem:[%s367_s17] sm:$0x3] %vm1227_vm7, %v1226_v16 }
 0x5f2   : > { %1633 = shalt.err (!%p1630_p4)
}
 0x5f3   : > { %1494 = dma.vmem_to_hbm [thread:$0]  (%p1760_p5), %s1243_s13, 32, %s1245_s21, %s1230_s14  }
 0x5f4 PF: > { %p1500_p7 = scmp.ge.s32.totalorder %s1668_s12, 2  ;;  %s1256_s23 = sand.u32 1, %s1656_s30  }
 0x5f5   : > { %s1257_s28 = scalar_lea.sflag [#allocation3], %s1256_s23 }
 0x5f6   : > { %p1497_p8 = pnand %p1500_p7, %p1764_p6 }
 0x5f8   : > { %p1498_p9 = pneg %p1497_p8 }
 0x5fa   : > { %1651 = dma.done.wait (%p1498_p9), %s1257_s28, 32  }
 0x5fb   : > { %1653 = vsyncadd (%p1498_p9), %s1257_s28, 4294967264  ;;  %p19_p10 = scmp.ge.s32.totalorder %s1747_s15, 4   ;;  %s2079_s30 = smov %s1660_s10 }
 0x5fc   : > { %s2080_s10 = smov %s1664_s11  ;;  %s2081_s11 = smov %s1758_s18 }
 0x5fd   : > { %s2082_s12 = smov %s1747_s15  ;;  %21 = sbr.rel (!%p19_p10) target bundleno = 3 (0x3), region = 100 }
 0x602   :  { %1263 = vsyncpa [#allocation3], 1 }
 0x603   :  { %1265 = vsyncpa [#allocation3 + $0x1], 1 }

</bundles_post_ra>
